<compile_context>
chip_gen: v6e
topology: v6e:2x2x1
jax: 0.10.0
libtpu: 0.0.40
codegen_flags: <defaults>
</compile_context>

<pallas_src>
import math

import jax
import jax.numpy as jnp
import numpy as np
from jax.experimental import pallas as pl
from jax.experimental.pallas import tpu as pltpu


_SMALL_INPUT_BYTES = 2 * 1024 * 1024   # in+out VMEM-resident -> single-step fast path
_MAX_SMALL_SEGMENTS = 64               # fast path statically unrolls over segments


def _vmem_capacity_bytes():
    """Physical VMEM per TensorCore; conservative fallback if the query fails."""
    try:
        cap = int(getattr(pltpu.get_tpu_info(), "vmem_capacity_bytes", 0))
        if cap > 0:
            return cap
    except Exception:
        pass
    return 64 * 1024 * 1024            # v7x per-TC value (smallest of the fleet)


def _block_budget_bytes(vmem_cap):
    """Target bytes per block.

    Pipeline footprint is ~4 buffers (in + out, double-buffered), so keep a
    block around vmem/10: ~6.4 MiB on v7x (64 MiB VMEM), capped at 12 MiB on
    v5e/v6e (128 MiB VMEM).  Multi-MiB blocks amortize the ~0.35us per-step
    overhead and get this pure-copy kernel near the HBM roofline.
    """
    return max(2 * 1024 * 1024, min(vmem_cap // 10, 12 * 1024 * 1024))


def _pick_d_tile(D, itemsize, rows, target_bytes):
    """Column tile: lane-dense multiple of 128 that DIVIDES D (never ragged)."""
    if D % 128 != 0:
        return D                       # full-extent block is always legal
    max_cols = max(128, target_bytes // max(1, rows * itemsize))
    if max_cols >= D:
        return D
    best = 128                         # 128 always divides D here
    cand = 256
    while cand <= max_cols:
        if D % cand == 0:
            best = cand
        cand += 128
    return best


def _maybe_pack_u32(x2d):
    """Bitcast sub-32-bit data to a uint32 container (exact, no value change).

    Keeps the 8-row blocks in the native f32 (8, 128) sublane layout so loads
    and stores stay unmasked full-vreg ops even for bf16/fp16/uint8 video.
    """
    itemsize = x2d.dtype.itemsize
    if itemsize >= 4:
        return x2d, None
    per_word = 4 // itemsize
    L, D = x2d.shape
    if D % per_word != 0:
        return x2d, None               # rare; fall back to the raw dtype
    packed = jax.lax.bitcast_convert_type(
        x2d.reshape(L, D // per_word, per_word), jnp.uint32)
    return packed, (x2d.dtype, per_word)


def _unpack_u32(seg3d, pack_info):
    if pack_info is None:
        return seg3d
    orig_dtype, per_word = pack_info
    n_seg, seg_size, Dp = seg3d.shape
    out = jax.lax.bitcast_convert_type(seg3d, orig_dtype)  # adds trailing per_word dim
    return out.reshape(n_seg, seg_size, Dp * per_word)


def _gather_segments_small(x2d, *, n_seg, seg_size, stride, L):
    """Small-input fast path: whole (L, D) input + output resident in VMEM."""
    _, D = x2d.shape
    rows_out = n_seg * seg_size

    def kernel(x_ref, o_ref):
        for s in range(n_seg):                       # static unroll (n_seg small)
            start = s * stride
            n_valid = min(seg_size, L - start)
            r0 = s * seg_size
            o_ref[r0:r0 + n_valid, :] = x_ref[start:start + n_valid, :]
            if n_valid < seg_size:
                o_ref[r0 + n_valid:r0 + seg_size, :] = jnp.zeros(
                    (seg_size - n_valid, D), dtype=x_ref.dtype)

    out2d = pl.pallas_call(
        kernel,
        out_shape=jax.ShapeDtypeStruct((rows_out, D), x2d.dtype),
    )(x2d)
    return out2d.reshape(n_seg, seg_size, D)


def _gather_segments_tiled(x2d, *, n_seg, seg_size, stride, L):
    """Tiled path: (L, D) -> (n_seg, seg_size, D), zero-padded past row L."""
    _, D = x2d.shape
    itemsize = x2d.dtype.itemsize
    g = math.gcd(stride, seg_size)     # row-block size (8 for the defaults)
    assert g % 8 == 0, "tiled path requires gcd(stride, seg_size) % 8 == 0"
    n_f = seg_size // g                # frame tiles per segment
    sb = stride // g                   # segment start, in row blocks
    nb = pl.cdiv(L, g)                 # row blocks covering the input

    vmem_cap = _vmem_capacity_bytes()
    d_tile = _pick_d_tile(D, itemsize, g, _block_budget_bytes(vmem_cap))
    n_d = pl.cdiv(D, d_tile)

    def kernel(x_ref, o_ref):
        s = pl.program_id(1)
        f = pl.program_id(2)
        base = s * stride + f * g      # global frame index of row 0

        # Hot path: every row valid -> straight copy, no select / zeros.
        @pl.when(base + g <= L)
        def _():
            o_ref[...] = x_ref[...]

        # Only blocks of the final segment that cross L pay the zero-pad select.
        @pl.when(base + g > L)
        def _():
            frame = base + jax.lax.broadcasted_iota(jnp.int32, (g, 1), 0)
            o_ref[...] = jnp.where(frame < L, x_ref[...],
                                   jnp.zeros_like(x_ref[...]))

    # Column axis OUTERMOST: with 50% overlap consecutive (s, f) steps revisit
    # the same input row block, so the pipeline skips the redundant HBM fetch
    # (input reads ~L*D instead of ~n_seg*seg*D).
    in_spec = pl.BlockSpec(
        (g, d_tile),
        # Clamp so the DMA never walks past the last row block; rows whose
        # true frame index >= L are zeroed in-kernel anyway.
        lambda d, s, f: (jnp.minimum(s * sb + f, nb - 1), d),
    )
    out_spec = pl.BlockSpec((None, g, d_tile), lambda d, s, f: (s, f, d))

    block_bytes = g * d_tile * itemsize
    footprint = 4 * block_bytes        # in + out, double-buffered
    vmem_limit = int(min(max(32 * 1024 * 1024, footprint + (8 << 20)),
                         (vmem_cap * 3) // 4))

    return pl.pallas_call(
        kernel,
        out_shape=jax.ShapeDtypeStruct((n_seg, seg_size, D), x2d.dtype),
        grid_spec=pltpu.PrefetchScalarGridSpec(
            num_scalar_prefetch=0,
            grid=(n_d, n_seg, n_f),
            in_specs=[in_spec],
            out_specs=out_spec,
        ),
        compiler_params=pltpu.CompilerParams(
            # All axes independent; megacore (v7x) may shard any parallel axis.
            dimension_semantics=("parallel", "parallel", "parallel"),
            vmem_limit_bytes=vmem_limit),
    )(x2d)


def generate_multiple_segments(item, segment_size_vframes=16, step_size_seg=0.5):
    """Pallas equivalent of GenerateMultipleSegments.forward."""
    video = item["video"]              # (L, C, H, W)
    L, C, H, W = video.shape
    stride = int(segment_size_vframes * step_size_seg)
    assert stride >= 1, "segment_size_vframes * step_size_seg must be >= 1"

    # Static (shape-only) segmentation schedule, identical to the torch loop.
    ranges = []
    start = 0
    while start < L:
        end = start + segment_size_vframes
        ranges.append([start, min(end, L)])
        if end >= L:
            break
        start += stride
    n_seg = len(ranges)

    D = C * H * W
    x2d, pack_info = _maybe_pack_u32(video.reshape(L, D))
    Dp = x2d.shape[1]
    itemsize = x2d.dtype.itemsize

    g = math.gcd(stride, segment_size_vframes)
    total_bytes = (L + n_seg * segment_size_vframes) * Dp * itemsize
    small_ok = (total_bytes <= _SMALL_INPUT_BYTES
                and n_seg <= _MAX_SMALL_SEGMENTS)

    if small_ok:
        seg3d = _gather_segments_small(
            x2d, n_seg=n_seg, seg_size=segment_size_vframes,
            stride=stride, L=L)
    elif g % 8 == 0:
        seg3d = _gather_segments_tiled(
            x2d, n_seg=n_seg, seg_size=segment_size_vframes,
            stride=stride, L=L)
    else:
        # TODO(synk): schedules whose gcd(stride, seg) is not a multiple of 8
        # (e.g. step_size_seg=0.25 -> stride=4) have no clean sublane-aligned
        # Pallas tiling for large inputs; fall back to an XLA gather.
        pad_rows = max(0, (n_seg - 1) * stride + segment_size_vframes - L)
        padded = jnp.pad(x2d, ((0, pad_rows), (0, 0)))
        idx = (jnp.arange(n_seg, dtype=jnp.int32)[:, None] * stride
               + jnp.arange(segment_size_vframes, dtype=jnp.int32)[None, :])
        seg3d = padded[idx]

    seg3d = _unpack_u32(seg3d, pack_info)
    out_video = seg3d.reshape(n_seg, segment_size_vframes, C, H, W)

    # mask[s, j, ...] = (s*stride + j) < L.  The full-size bool tensor is part
    # of the module's output contract, so it must be materialized; it is a
    # write-only broadcast of the compact (n_seg, seg_size) validity matrix.
    frame_idx = (jnp.arange(n_seg, dtype=jnp.int32)[:, None] * stride
                 + jnp.arange(segment_size_vframes, dtype=jnp.int32)[None, :])
    valid = frame_idx < L              # (n_seg, seg_size) bool
    mask = jnp.broadcast_to(valid[:, :, None, None, None],
                            (n_seg, segment_size_vframes, C, H, W))

    out = dict(item)
    out["video"] = out_video
    out["mask"] = mask
    # TODO(synk): torch uses int64 (long) here; with JAX default x64-disabled
    # these are int32.
    out["v_ranges"] = jnp.asarray(ranges, dtype=jnp.int32)
    out["vlen_frames"] = jnp.asarray(L, dtype=jnp.int32)
    return out


def _reference_numpy(video, seg=16, step=0.5):
    """Pure-numpy transcription of the PyTorch module for verification."""
    L, C, H, W = video.shape
    stride = int(seg * step)
    segs, masks, ranges = [], [], []
    start = 0
    while start < L:
        end = start + seg
        if end >= L:
            valid = video[start:L]
            pad = np.zeros((end - L, C, H, W), dtype=video.dtype)
            segs.append(np.concatenate([valid, pad], axis=0))
            m = np.concatenate(
                [np.ones((valid.shape[0], C, H, W), dtype=bool),
                 np.zeros((pad.shape[0], C, H, W), dtype=bool)], axis=0)
            masks.append(m)
            ranges.append([start, L])
            break
        segs.append(video[start:end])
        masks.append(np.ones((seg, C, H, W), dtype=bool))
        ranges.append([start, end])
        start += stride
    return np.stack(segs, 0), np.stack(masks, 0), np.asarray(ranges)


def _check_case(video, seg, step):
    item = {"video": video}
    out = generate_multiple_segments(item, segment_size_vframes=seg,
                                     step_size_seg=step)
    jax.block_until_ready(out)

    ref_in = np.asarray(video.astype(jnp.float32))
    ref_video, ref_mask, ref_ranges = _reference_numpy(ref_in, seg=seg, step=step)

    got_video = np.asarray(out["video"].astype(jnp.float32))
    assert out["video"].shape == ref_video.shape
    assert out["video"].dtype == video.dtype
    assert np.array_equal(got_video, ref_video)

    assert out["mask"].shape == ref_mask.shape
    assert out["mask"].dtype == jnp.bool_
    assert np.array_equal(np.asarray(out["mask"]), ref_mask)

    assert np.array_equal(np.asarray(out["v_ranges"]), ref_ranges)
    assert int(out["vlen_frames"]) == video.shape[0]


if __name__ == "__main__":
    key = jax.random.PRNGKey(0)
    k1, k2, k3 = jax.random.split(key, 3)

    # 1) Small clip (VMEM-resident fast path): 28 frames, 4 channels, 16x16.
    #    Segments (size 16, stride 8): [0,16), [8,24), [16,28)+4 padded frames.
    v_small = jax.random.normal(k1, (28, 4, 16, 16), dtype=jnp.float32)
    _check_case(v_small, 16, 0.5)

    # 2) Larger f32 video -> tiled Pallas path (grid = (n_d, n_seg, n_f)),
    #    final segment [32, 44) padded with 4 zero frames.
    v_big = jax.random.normal(k2, (44, 8, 64, 64), dtype=jnp.float32)
    _check_case(v_big, 16, 0.5)

    # 3) bf16 video -> tiled path on the uint32-packed view (sublane hygiene).
    v_bf16 = jax.random.normal(k3, (44, 8, 64, 64), dtype=jnp.bfloat16)
    _check_case(v_bf16, 16, 0.5)

    print("KERNEL_OK")
</pallas_src>

<mosaic_0001>
module attributes {stable_mosaic.version = 11 : i64} {
  func.func @kernel(%arg0: memref<28x1024xf32, #tpu.memory_space<vmem>>, %arg1: memref<48x1024xf32, #tpu.memory_space<vmem>>) attributes {dimension_semantics = [], scalar_prefetch = 0 : i64, scratch_operands = 0 : i64, tpu.core_type = #tpu.core_type<tc>} {
    %c0 = arith.constant 0 : index
    %c0_0 = arith.constant 0 : index
    %0 = vector.load %arg0[%c0, %c0_0] : memref<28x1024xf32, #tpu.memory_space<vmem>>, vector<16x1024xf32>
    %c0_1 = arith.constant 0 : index
    %c0_2 = arith.constant 0 : index
    %1 = vector.load %arg1[%c0_1, %c0_2] : memref<48x1024xf32, #tpu.memory_space<vmem>>, vector<16x1024xf32>
    tpu.vector_store %arg1[%c0_1, %c0_2], %0 {strides = array<i32>} : memref<48x1024xf32, #tpu.memory_space<vmem>>, vector<16x1024xf32>,
    %c8 = arith.constant 8 : index
    %c0_3 = arith.constant 0 : index
    %2 = vector.load %arg0[%c8, %c0_3] : memref<28x1024xf32, #tpu.memory_space<vmem>>, vector<16x1024xf32>
    %c16 = arith.constant 16 : index
    %c0_4 = arith.constant 0 : index
    %3 = vector.load %arg1[%c16, %c0_4] : memref<48x1024xf32, #tpu.memory_space<vmem>>, vector<16x1024xf32>
    tpu.vector_store %arg1[%c16, %c0_4], %2 {strides = array<i32>} : memref<48x1024xf32, #tpu.memory_space<vmem>>, vector<16x1024xf32>,
    %c16_5 = arith.constant 16 : index
    %c0_6 = arith.constant 0 : index
    %4 = vector.load %arg0[%c16_5, %c0_6] : memref<28x1024xf32, #tpu.memory_space<vmem>>, vector<12x1024xf32>
    %c32 = arith.constant 32 : index
    %c0_7 = arith.constant 0 : index
    %5 = vector.load %arg1[%c32, %c0_7] : memref<48x1024xf32, #tpu.memory_space<vmem>>, vector<12x1024xf32>
    tpu.vector_store %arg1[%c32, %c0_7], %4 {strides = array<i32>} : memref<48x1024xf32, #tpu.memory_space<vmem>>, vector<12x1024xf32>,
    %cst = arith.constant 0.000000e+00 : f32
    %6 = vector.broadcast %cst : f32 to vector<4x1024xf32>
    %c44 = arith.constant 44 : index
    %c0_8 = arith.constant 0 : index
    %7 = vector.load %arg1[%c44, %c0_8] : memref<48x1024xf32, #tpu.memory_space<vmem>>, vector<4x1024xf32>
    tpu.vector_store %arg1[%c44, %c0_8], %6 {strides = array<i32>} : memref<48x1024xf32, #tpu.memory_space<vmem>>, vector<4x1024xf32>,
    return
  }
}

</mosaic_0001>

<bundles_post_ra>
// kernel: tpu_custom_call.1
= control target key start
LH: loop header
LB: loop body
LE: loop exit
PB: predicated region body
PF: predicated region fallthrough
CT: control target
= control target key end

     0   :  { %6 = vsyncpa [#allocation3], 0  ;;  %s220_s0 = inlined_call_operand.hbm [shape: f32[28,1024], index: 0, kind: input, shape index: {}]   ;;  %s221_s1 = inlined_call_operand.hbm [shape: f32[48,1024], index: 1, kind: output, shape index: {}]  }
   0x1   :  { %7 = vsyncpa [#allocation4], 0  ;;  %s193_s6 = smov [#allocation2]  }
   0x2   :  { %s13_s7 = sshll.u32 %s193_s6, 4  ;;  %s14_s7 = int_to_ptr.vmem [resolvable:$true] %s13_s7 }
   0x3   :  { %s157_s8 = scalar_lea.vmem %s14_s7, 4096  ;;  %p162_p1 = scmp.lt.s32.totalorder %s14_s7, %s14_s7 }
   0x4   :  { %p158_p0 = scmp.ne.s32.totalorder %s14_s7, %s157_s8  ;;  %p163_p2 = scmp.lt.s32.totalorder %s157_s8, %s157_s8 }
   0x6   :  { %p164_p3 = por %p163_p2, %p162_p1 }
   0x8   :  { %p165_p4 = pnand %p164_p3, %p158_p0 }
   0xa   :  { %168 = shalt.err (!%p165_p4)
}
   0xb   :  { %s194_s9 = smov 1024   ;;  %s195_s10 = smov 64  }
   0xc   :  { %19 = dma.hbm_to_vmem [thread:$0]  %s220_s0, 4096, %s14_s7, [#allocation3], %s194_s9, %s194_s9, %s195_s10  }
   0xd   :  { %189 = dma.done.wait [#allocation3], 4096  }
   0xe   :  { %190 = vsyncadd [#allocation3], 4294963200  ;;  %v196_v0 = vmov 0.0   ;;  %v23_v1 = vld [vmem:[#allocation2] sm:$0xff]  ;;  %v24_v2 = vld [vmem:[#allocation2 + $0x8] sm:$0xff]  ;;  %s197_s0 = smov [#allocation5]  }
   0xf   :  { %119 = vst [vmem:[#allocation5 + $0x140] sm:$0xf0] %v196_v0  ;;  %120 = vst [vmem:[#allocation5 + $0x148] sm:$0xf0] %v196_v0  ;;  %v25_v3 = vld [vmem:[#allocation2 + $0x10] sm:$0xff]  ;;  %v26_v4 = vld [vmem:[#allocation2 + $0x18] sm:$0xff] }
  0x10   :  { %121 = vst [vmem:[#allocation5 + $0x150] sm:$0xf0] %v196_v0  ;;  %122 = vst [vmem:[#allocation5 + $0x158] sm:$0xf0] %v196_v0  ;;  %v27_v5 = vld [vmem:[#allocation2 + $0x20] sm:$0xff]  ;;  %v28_v6 = vld [vmem:[#allocation2 + $0x28] sm:$0xff] }
  0x11   :  { %123 = vst [vmem:[#allocation5 + $0x160] sm:$0xf0] %v196_v0  ;;  %124 = vst [vmem:[#allocation5 + $0x168] sm:$0xf0] %v196_v0  ;;  %v29_v7 = vld [vmem:[#allocation2 + $0x30] sm:$0xff]  ;;  %v30_v8 = vld [vmem:[#allocation2 + $0x38] sm:$0xff] }
  0x12   :  { %125 = vst [vmem:[#allocation5 + $0x170] sm:$0xf0] %v196_v0  ;;  %126 = vst [vmem:[#allocation5 + $0x178] sm:$0xf0] %v196_v0  ;;  %v31_v9 = vld [vmem:[#allocation2 + $0x40] sm:$0xff]  ;;  %v32_v10 = vld [vmem:[#allocation2 + $0x48] sm:$0xff] }
  0x13   :  { %39 = vst [vmem:[#allocation5] sm:$0xff] %v23_v1  ;;  %40 = vst [vmem:[#allocation5 + $0x8] sm:$0xff] %v24_v2  ;;  %v33_v11 = vld [vmem:[#allocation2 + $0x50] sm:$0xff]  ;;  %v34_v12 = vld [vmem:[#allocation2 + $0x58] sm:$0xff]  ;;  %s132_s13 = sshll.u32 %s197_s0, 4  ;;  %s133_s13 = int_to_ptr.vmem [resolvable:$true] %s132_s13 }
  0x14   :  { %41 = vst [vmem:[#allocation5 + $0x10] sm:$0xff] %v25_v3  ;;  %42 = vst [vmem:[#allocation5 + $0x18] sm:$0xff] %v26_v4  ;;  %v35_v13 = vld [vmem:[#allocation2 + $0x60] sm:$0xff]  ;;  %v36_v14 = vld [vmem:[#allocation2 + $0x68] sm:$0xff]  ;;  %s169_s14 = scalar_lea.vmem %s133_s13, 6144  ;;  %p174_p6 = scmp.lt.s32.totalorder %s133_s13, %s133_s13 }
  0x15   :  { %43 = vst [vmem:[#allocation5 + $0x20] sm:$0xff] %v27_v5  ;;  %44 = vst [vmem:[#allocation5 + $0x28] sm:$0xff] %v28_v6  ;;  %v37_v15 = vld [vmem:[#allocation2 + $0x70] sm:$0xff]  ;;  %v38_v16 = vld [vmem:[#allocation2 + $0x78] sm:$0xff]  ;;  %p170_p5 = scmp.ne.s32.totalorder %s133_s13, %s169_s14  ;;  %p175_p7 = scmp.lt.s32.totalorder %s169_s14, %s169_s14 }
  0x16   :  { %45 = vst [vmem:[#allocation5 + $0x30] sm:$0xff] %v29_v7  ;;  %46 = vst [vmem:[#allocation5 + $0x38] sm:$0xff] %v30_v8  ;;  %v63_v17 = vld [vmem:[#allocation2 + $0x80] sm:$0xff]  ;;  %v64_v18 = vld [vmem:[#allocation2 + $0x88] sm:$0xff] }
  0x17   :  { %47 = vst [vmem:[#allocation5 + $0x40] sm:$0xff] %v31_v9  ;;  %71 = vst [vmem:[#allocation5 + $0x80] sm:$0xff] %v31_v9  ;;  %v65_v19 = vld [vmem:[#allocation2 + $0x90] sm:$0xff]  ;;  %v66_v20 = vld [vmem:[#allocation2 + $0x98] sm:$0xff]  ;;  %p176_p8 = por %p175_p7, %p174_p6 }
  0x18   :  { %48 = vst [vmem:[#allocation5 + $0x48] sm:$0xff] %v32_v10  ;;  %49 = vst [vmem:[#allocation5 + $0x50] sm:$0xff] %v33_v11  ;;  %v67_v21 = vld [vmem:[#allocation2 + $0xa0] sm:$0xff]  ;;  %v68_v22 = vld [vmem:[#allocation2 + $0xa8] sm:$0xff] }
  0x19   :  { %50 = vst [vmem:[#allocation5 + $0x58] sm:$0xff] %v34_v12  ;;  %72 = vst [vmem:[#allocation5 + $0x88] sm:$0xff] %v32_v10  ;;  %v69_v23 = vld [vmem:[#allocation2 + $0xb0] sm:$0xff]  ;;  %v70_v24 = vld [vmem:[#allocation2 + $0xb8] sm:$0xff]  ;;  %p177_p9 = pnand %p176_p8, %p170_p5 }
  0x1a   :  { %73 = vst [vmem:[#allocation5 + $0x90] sm:$0xff] %v33_v11  ;;  %74 = vst [vmem:[#allocation5 + $0x98] sm:$0xff] %v34_v12  ;;  %v95_v25 = vld [vmem:[#allocation2 + $0xc0] sm:$0xf]  ;;  %v96_v26 = vld [vmem:[#allocation2 + $0xc8] sm:$0xf] }
  0x1b   :  { %51 = vst [vmem:[#allocation5 + $0x60] sm:$0xff] %v35_v13  ;;  %52 = vst [vmem:[#allocation5 + $0x68] sm:$0xff] %v36_v14  ;;  %v97_v27 = vld [vmem:[#allocation2 + $0xd0] sm:$0xf]  ;;  %v98_v28 = vld [vmem:[#allocation2 + $0xd8] sm:$0xf] }
  0x1c   :  { %53 = vst [vmem:[#allocation5 + $0x70] sm:$0xff] %v37_v15  ;;  %75 = vst [vmem:[#allocation5 + $0xa0] sm:$0xff] %v35_v13  ;;  %v99_v29 = vld [vmem:[#allocation2 + $0xe0] sm:$0xf]  ;;  %v100_v30 = vld [vmem:[#allocation2 + $0xe8] sm:$0xf] }
  0x1d   :  { %76 = vst [vmem:[#allocation5 + $0xa8] sm:$0xff] %v36_v14  ;;  %77 = vst [vmem:[#allocation5 + $0xb0] sm:$0xff] %v37_v15  ;;  %v101_v31 = vld [vmem:[#allocation2 + $0xf0] sm:$0xf]  ;;  %v102_v32 = vld [vmem:[#allocation2 + $0xf8] sm:$0xf] }
  0x1e   :  { %54 = vst [vmem:[#allocation5 + $0x78] sm:$0xff] %v38_v16  ;;  %78 = vst [vmem:[#allocation5 + $0xb8] sm:$0xff] %v38_v16 }
  0x1f   :  { %79 = vst [vmem:[#allocation5 + $0xc0] sm:$0xff] %v63_v17  ;;  %80 = vst [vmem:[#allocation5 + $0xc8] sm:$0xff] %v64_v18 }
  0x20   :  { %103 = vst [vmem:[#allocation5 + $0x100] sm:$0xff] %v63_v17  ;;  %104 = vst [vmem:[#allocation5 + $0x108] sm:$0xff] %v64_v18 }
  0x21   :  { %81 = vst [vmem:[#allocation5 + $0xd0] sm:$0xff] %v65_v19  ;;  %82 = vst [vmem:[#allocation5 + $0xd8] sm:$0xff] %v66_v20 }
  0x22   :  { %83 = vst [vmem:[#allocation5 + $0xe0] sm:$0xff] %v67_v21  ;;  %105 = vst [vmem:[#allocation5 + $0x110] sm:$0xff] %v65_v19 }
  0x23   :  { %106 = vst [vmem:[#allocation5 + $0x118] sm:$0xff] %v66_v20  ;;  %107 = vst [vmem:[#allocation5 + $0x120] sm:$0xff] %v67_v21 }
  0x24   :  { %84 = vst [vmem:[#allocation5 + $0xe8] sm:$0xff] %v68_v22  ;;  %85 = vst [vmem:[#allocation5 + $0xf0] sm:$0xff] %v69_v23 }
  0x25   :  { %86 = vst [vmem:[#allocation5 + $0xf8] sm:$0xff] %v70_v24  ;;  %108 = vst [vmem:[#allocation5 + $0x128] sm:$0xff] %v68_v22 }
  0x26   :  { %109 = vst [vmem:[#allocation5 + $0x130] sm:$0xff] %v69_v23  ;;  %110 = vst [vmem:[#allocation5 + $0x138] sm:$0xff] %v70_v24 }
  0x27   :  { %111 = vst [vmem:[#allocation5 + $0x140] sm:$0xf] %v95_v25  ;;  %112 = vst [vmem:[#allocation5 + $0x148] sm:$0xf] %v96_v26 }
  0x28   :  { %113 = vst [vmem:[#allocation5 + $0x150] sm:$0xf] %v97_v27  ;;  %114 = vst [vmem:[#allocation5 + $0x158] sm:$0xf] %v98_v28 }
  0x29   :  { %115 = vst [vmem:[#allocation5 + $0x160] sm:$0xf] %v99_v29  ;;  %116 = vst [vmem:[#allocation5 + $0x168] sm:$0xf] %v100_v30 }
  0x2a   :  { %117 = vst [vmem:[#allocation5 + $0x170] sm:$0xf] %v101_v31  ;;  %118 = vst [vmem:[#allocation5 + $0x178] sm:$0xf] %v102_v32 }
  0x2b   :  { %180 = shalt.err (!%p177_p9)
}
  0x2c   :  { %138 = dma.vmem_to_hbm [thread:$0]  %s133_s13, 6144, %s221_s1, [#allocation4], %s194_s9, %s194_s9, %s195_s10  }
  0x2d   :  { %191 = dma.done.wait [#allocation4], 6144  }
  0x2e   :  { %192 = vsyncadd [#allocation4], 4294961152 }
  0x2f   :  { %142 = vsyncpa [#allocation3], 1 }
  0x30   :  { %143 = vsyncpa [#allocation4], 1 }

</bundles_post_ra>
